<compile_context>
chip_gen: v7x
topology: tpu7x:2x2x1
jax: 0.10.0
libtpu: 0.0.40
codegen_flags: <defaults>
</compile_context>

<pallas_src>
import functools

import jax
import jax.numpy as jnp
from jax import lax
from jax.experimental import pallas as pl
from jax.experimental.pallas import tpu as pltpu

LANE = 128
SUBLANE = 8                      # f32 sublane count; accumulator is (8, 128)
MAX_TILE_ROWS = 4096             # (4096, 128) f32 = 2 MiB per input buffer
CHUNK_ROWS = 256                 # in-kernel compute chunk: 32 f32 vregs live
VMEM_LIMIT_BYTES = 32 * 1024 * 1024


def _is_v7x():
    """Best-effort detection of a 2-TensorCore (v7x-class) chip."""
    try:
        kind = jax.devices()[0].device_kind.lower()
        return "v7" in kind
    except Exception:
        return False


def _ssd_kernel(inp_ref, tgt_ref, out_ref, *, rows, tile_rows, tiles_per_split,
                chunk, need_mask):
    """Accumulates sum((inp - tgt)^2) of this split's tiles into out_ref (8, 128)."""
    c = pl.program_id(0)   # split index (CORE_PARALLEL on v7x, trivial otherwise)
    i = pl.program_id(1)   # tile within the split ("arbitrary": reduction axis)

    @pl.when(i == 0)
    def _():
        out_ref[...] = jnp.zeros_like(out_ref)

    tile_start = (c * tiles_per_split + i) * tile_rows
    n_full = tile_rows // chunk        # static
    rem = tile_rows % chunk            # static; multiple of the sublane count

    def chunk_ssd(start, size, valid_rows):
        d = (inp_ref[pl.ds(start, size), :].astype(jnp.float32)
             - tgt_ref[pl.ds(start, size), :].astype(jnp.float32))
        if valid_rows is not None:
            # Select (not multiply) BEFORE squaring so garbage in padded rows
            # (NaN/Inf) can never reach the accumulator.
            row_ids = lax.broadcasted_iota(jnp.int32, (size, 1), 0)
            d = jnp.where(start + row_ids < valid_rows, d, 0.0)
        sq = d * d
        # Fold the chunk onto the (8, 128) vreg-shaped accumulator: pure VPU adds.
        return jnp.sum(sq.reshape(size // SUBLANE, SUBLANE, LANE), axis=0)

    def run(masked):
        valid_rows = (rows - tile_start) if masked else None

        def body(j, acc):
            s = pl.multiple_of(j * chunk, chunk)
            return acc + chunk_ssd(s, chunk, valid_rows)

        acc = lax.fori_loop(0, n_full, body,
                            jnp.zeros((SUBLANE, LANE), jnp.float32),
                            unroll=True)
        if rem:
            acc = acc + chunk_ssd(n_full * chunk, rem, valid_rows)
        out_ref[...] += acc

    if need_mask:
        is_boundary = tile_start + tile_rows > rows

        @pl.when(tile_start + tile_rows <= rows)   # interior tiles: no mask work
        def _():
            run(masked=False)

        @pl.when(is_boundary)                      # only the last tile pays
        def _():
            run(masked=True)
    else:
        run(masked=False)


def scaled_mse_loss(inp, tgt, scale_factor=10000.0):
    assert inp.shape == tgt.shape, (inp.shape, tgt.shape)
    n_elems = inp.size

    flat_i = inp.reshape(-1)
    flat_t = tgt.reshape(-1)

    # Min-tile sublane multiple for the input dtype (8 f32 / 16 bf16 / 32 int8).
    itemsize = jnp.dtype(inp.dtype).itemsize
    sub_mult = max(SUBLANE, 32 // max(1, itemsize))

    # Rows handled by the kernel: lane-dense AND a multiple of the sublane
    # multiple, so block shapes never exceed the array and always lower.
    rows = (n_elems // (sub_mult * LANE)) * sub_mult
    main = rows * LANE
    tail = n_elems - main   # < sub_mult * 128 elements, reduced in plain JAX

    ssd = jnp.zeros((), jnp.float32)

    if rows > 0:
        x2d = flat_i[:main].reshape(rows, LANE)   # metadata-only views
        t2d = flat_t[:main].reshape(rows, LANE)

        tile_rows = min(MAX_TILE_ROWS, rows)      # biggest tile that exists
        n_tiles = pl.cdiv(rows, tile_rows)
        need_mask = (rows % tile_rows) != 0
        chunk = min(CHUNK_ROWS, tile_rows)

        # 2-way split only where it genuinely lands on two TensorCores (v7x)
        # and the tiles divide evenly: no duplicate-tile DMA, no clamped maps.
        num_splits = 2 if (_is_v7x() and n_tiles >= 2 and n_tiles % 2 == 0) else 1
        tiles_per_split = n_tiles // num_splits

        if num_splits > 1:
            dim_sem = (pltpu.CORE_PARALLEL, pltpu.ARBITRARY)
        else:
            dim_sem = ("parallel", "arbitrary")

        kernel = functools.partial(
            _ssd_kernel,
            rows=rows, tile_rows=tile_rows, tiles_per_split=tiles_per_split,
            chunk=chunk, need_mask=need_mask,
        )

        def in_idx(c, i):
            return (c * tiles_per_split + i, 0)

        partials = pl.pallas_call(
            kernel,
            out_shape=jax.ShapeDtypeStruct((num_splits * SUBLANE, LANE),
                                           jnp.float32),
            grid_spec=pltpu.PrefetchScalarGridSpec(
                num_scalar_prefetch=0,
                grid=(num_splits, tiles_per_split),
                in_specs=[
                    pl.BlockSpec((tile_rows, LANE), in_idx),
                    pl.BlockSpec((tile_rows, LANE), in_idx),
                ],
                out_specs=pl.BlockSpec((SUBLANE, LANE), lambda c, i: (c, 0)),
            ),
            compiler_params=pltpu.CompilerParams(
                dimension_semantics=dim_sem,
                vmem_limit_bytes=VMEM_LIMIT_BYTES,
            ),
        )(x2d, t2d)

        ssd = ssd + jnp.sum(partials)   # single small cross-lane reduce, once

    if tail:
        dt = flat_i[main:].astype(jnp.float32) - flat_t[main:].astype(jnp.float32)
        ssd = ssd + jnp.sum(dt * dt)

    return ssd * (scale_factor / n_elems)


if __name__ == "__main__":
    key = jax.random.PRNGKey(0)
    scale = 10000.0

    shapes = [
        (2, 4, 16, 16),    # primary: small NCHW predictor output (single even tile)
        (2, 3, 20, 24),    # not a multiple of 8*128: exercises the plain-JAX tail
        (8, 16, 64, 72),   # rows=4608 -> 2 tiles, masked boundary tile (even split on v7x)
        (8, 16, 96, 96),   # rows=9216 -> 3 tiles (odd), single split + masked last tile
    ]

    primary_loss = None
    for shape in shapes:
        key, k1, k2 = jax.random.split(key, 3)
        inp = jax.random.normal(k1, shape, dtype=jnp.float32)
        tgt = jax.random.normal(k2, shape, dtype=jnp.float32)

        loss = scaled_mse_loss(inp, tgt, scale_factor=scale)
        jax.block_until_ready(loss)
        if primary_loss is None:
            primary_loss = loss

        # Reference check (plain JAX) to validate semantics.
        ref = jnp.mean((inp - tgt).astype(jnp.float32) ** 2) * scale
        assert jnp.allclose(loss, ref, rtol=1e-4, atol=1e-2), (shape, float(loss), float(ref))

    print("KERNEL_OK")
</pallas_src>

<mosaic_0001>
module attributes {stable_mosaic.version = 11 : i64} {
  func.func @_ssd_kernel(%arg0: i32, %arg1: i32, %arg2: memref<16x128xf32, #tpu.memory_space<vmem>>, %arg3: memref<16x128xf32, #tpu.memory_space<vmem>>, %arg4: memref<8x128xf32, #tpu.memory_space<vmem>>) attributes {dimension_semantics = [#tpu.dimension_semantics<parallel>, #tpu.dimension_semantics<arbitrary>], iteration_bounds = array<i64: 1, 1>, scalar_prefetch = 0 : i64, scratch_operands = 0 : i64, tpu.core_type = #tpu.core_type<tc>, window_params = [{transform_indices = @transform_0, window_bounds = array<i64: 16, 128>}, {transform_indices = @transform_1, window_bounds = array<i64: 16, 128>}, {transform_indices = @transform_2, window_bounds = array<i64: 8, 128>}]} {
    %c0_i32 = arith.constant 0 : i32
    %0 = arith.cmpi eq, %arg1, %c0_i32 : i32
    %1 = arith.extui %0 : i1 to i32
    %c0_i32_0 = arith.constant 0 : i32
    %2 = arith.cmpi ne, %1, %c0_i32_0 : i32
    scf.if %2 {
      %cst_8 = arith.constant 0.000000e+00 : f32
      %18 = vector.broadcast %cst_8 : f32 to vector<8x128xf32>
      %c0_9 = arith.constant 0 : index
      %c0_10 = arith.constant 0 : index
      %19 = vector.load %arg4[%c0_9, %c0_10] : memref<8x128xf32, #tpu.memory_space<vmem>>, vector<8x128xf32>
      tpu.vector_store %arg4[%c0_9, %c0_10], %18 {strides = array<i32>} : memref<8x128xf32, #tpu.memory_space<vmem>>, vector<8x128xf32>,
    } else {
    }
    %cst = arith.constant 0.000000e+00 : f32
    %3 = vector.broadcast %cst : f32 to vector<8x128xf32>
    %c0_i32_1 = arith.constant 0 : i32
    %c16_i32 = arith.constant 16 : i32
    %4 = arith.muli %c0_i32_1, %c16_i32 : i32
    %5 = tpu.assume_multiple %4, 16 : i32
    %6 = arith.index_cast %5 : i32 to index
    %c0 = arith.constant 0 : index
    %7 = vector.load %arg2[%6, %c0] : memref<16x128xf32, #tpu.memory_space<vmem>>, vector<16x128xf32>
    %8 = arith.index_cast %5 : i32 to index
    %c0_2 = arith.constant 0 : index
    %9 = vector.load %arg3[%8, %c0_2] : memref<16x128xf32, #tpu.memory_space<vmem>>, vector<16x128xf32>
    %10 = arith.subf %7, %9 : vector<16x128xf32>
    %11 = arith.mulf %10, %10 : vector<16x128xf32>
    %12 = vector.shape_cast %11 : vector<16x128xf32> to vector<2x8x128xf32>
    %cst_3 = arith.constant dense<0.000000e+00> : vector<8x128xf32>
    %13 = vector.multi_reduction <add>, %12, %cst_3 [0] : vector<2x8x128xf32> to vector<8x128xf32>
    %14 = arith.addf %3, %13 : vector<8x128xf32>
    %c1_i32 = arith.constant 1 : i32
    %c0_4 = arith.constant 0 : index
    %c0_5 = arith.constant 0 : index
    %15 = vector.load %arg4[%c0_4, %c0_5] : memref<8x128xf32, #tpu.memory_space<vmem>>, vector<8x128xf32>
    %16 = arith.addf %15, %14 : vector<8x128xf32>
    %c0_6 = arith.constant 0 : index
    %c0_7 = arith.constant 0 : index
    %17 = vector.load %arg4[%c0_6, %c0_7] : memref<8x128xf32, #tpu.memory_space<vmem>>, vector<8x128xf32>
    tpu.vector_store %arg4[%c0_6, %c0_7], %16 {strides = array<i32>} : memref<8x128xf32, #tpu.memory_space<vmem>>, vector<8x128xf32>,
    return
  }
  func.func @transform_0(%arg0: i32, %arg1: i32) -> (i32, i32) {
    %c1_i32 = arith.constant 1 : i32
    %0 = arith.muli %arg0, %c1_i32 : i32
    %1 = arith.addi %0, %arg1 : i32
    %c0_i32 = arith.constant 0 : i32
    %c0_i32_0 = arith.constant 0 : i32
    return %1, %c0_i32 : i32, i32
  }
  func.func @transform_1(%arg0: i32, %arg1: i32) -> (i32, i32) {
    %c1_i32 = arith.constant 1 : i32
    %0 = arith.muli %arg0, %c1_i32 : i32
    %1 = arith.addi %0, %arg1 : i32
    %c0_i32 = arith.constant 0 : i32
    %c0_i32_0 = arith.constant 0 : i32
    return %1, %c0_i32 : i32, i32
  }
  func.func @transform_2(%arg0: i32, %arg1: i32) -> (i32, i32) {
    %c0_i32 = arith.constant 0 : i32
    %c0_i32_0 = arith.constant 0 : i32
    return %arg0, %c0_i32 : i32, i32
  }
}

</mosaic_0001>

<bundles_post_ra>
// kernel: tpu_custom_call.1
= control target key start
LH: loop header
LB: loop body
LE: loop exit
PB: predicated region body
PF: predicated region fallthrough
CT: control target
= control target key end

     0   :  { %7 = vsyncpa [#allocation3], 0  ;;  %s220_s0 = inlined_call_operand.hbm [shape: f32[16,128], index: 0, kind: input, shape index: {}]   ;;  %s221_s1 = inlined_call_operand.hbm [shape: f32[16,128], index: 1, kind: input, shape index: {}]   ;;  %s222_s2 = inlined_call_operand.hbm [shape: f32[8,128], index: 2, kind: output, shape index: {}]  }
   0x1   :  { %8 = vsyncpa [#allocation6], 0 }
   0x2   :  { %9 = vsyncpa [#allocation4], 0  ;;  %s164_s9 = smov [#allocation2]   ;;  %s92_s13 = scalar_lea.hbm %s220_s0, 256 }
   0x3   :  { %s19_s10 = sshll.u32 %s164_s9, 4  ;;  %p93_p0 = scmp.ne.s32.totalorder %s220_s0, %s92_s13  ;;  %s20_s10 = int_to_ptr.vmem [resolvable:$true] %s19_s10 }
   0x4   :  { %p96_p1 = scmp.lt.u32.totalorder %s92_s13, %s220_s0 }
   0x6   :  { %p98_p2 = pnand %p96_p1, %p93_p0 }
   0x8   :  { %101 = shalt.err (!%p98_p2)
}
   0x9   :  { %s102_s18 = scalar_lea.vmem %s20_s10, 256  ;;  %p107_p4 = scmp.lt.s32.totalorder %s20_s10, %s20_s10 }
   0xa   :  { %p103_p3 = scmp.ne.s32.totalorder %s20_s10, %s102_s18  ;;  %p108_p5 = scmp.lt.s32.totalorder %s102_s18, %s102_s18 }
   0xc   :  { %p109_p6 = por %p108_p5, %p107_p4 }
   0xe   :  { %p110_p7 = pnand %p109_p6, %p103_p3 }
  0x10   :  { %113 = shalt.err (!%p110_p7)
}
  0x11   :  { %s165_s19 = smov 128   ;;  %s166_s20 = smov 8  }
  0x12   :  { %25 = dma.hbm_to_vmem [thread:$0]  %s220_s0, 256, %s20_s10, [#allocation3], %s165_s19, %s165_s19, %s166_s20  }
  0x13   :  { %s167_s23 = smov [#allocation5]   ;;  %s114_s27 = scalar_lea.hbm %s221_s1, 256 }
  0x14   :  { %s35_s24 = sshll.u32 %s167_s23, 4  ;;  %p115_p8 = scmp.ne.s32.totalorder %s221_s1, %s114_s27  ;;  %s36_s24 = int_to_ptr.vmem [resolvable:$true] %s35_s24 }
  0x15   :  { %p118_p9 = scmp.lt.u32.totalorder %s114_s27, %s221_s1 }
  0x17   :  { %p120_p10 = pnand %p118_p9, %p115_p8 }
  0x19   :  { %123 = shalt.err (!%p120_p10)
}
  0x1a   :  { %s124_s4 = scalar_lea.vmem %s36_s24, 256  ;;  %p129_p12 = scmp.lt.s32.totalorder %s36_s24, %s36_s24 }
  0x1b   :  { %p125_p11 = scmp.ne.s32.totalorder %s36_s24, %s124_s4  ;;  %p130_p13 = scmp.lt.s32.totalorder %s124_s4, %s124_s4 }
  0x1d   :  { %p131_p0 = por %p130_p13, %p129_p12 }
  0x1f   :  { %p132_p1 = pnand %p131_p0, %p125_p11 }
  0x21   :  { %135 = shalt.err (!%p132_p1)
}
  0x22   :  { %41 = dma.hbm_to_vmem [thread:$0]  %s221_s1, 256, %s36_s24, [#allocation6], %s165_s19, %s165_s19, %s166_s20  }
  0x23   :  { %158 = dma.done.wait [#allocation3], 256  }
  0x24   :  { %159 = vsyncadd [#allocation3], 4294967040 }
  0x25   :  { %160 = dma.done.wait [#allocation6], 256  }
  0x26   :  { %161 = vsyncadd [#allocation6], 4294967040  ;;  %v57_v0 = vld [vmem:[#allocation2] sm:$0xff]  ;;  %v58_v1 = vld [vmem:[#allocation2 + $0x8] sm:$0xff]  ;;  %s168_s6 = smov [#allocation7]  }
  0x27   :  { %v59_v2 = vld [vmem:[#allocation5] sm:$0xff]  ;;  %v60_v3 = vld [vmem:[#allocation5 + $0x8] sm:$0xff]  ;;  %s76_s7 = sshll.u32 %s168_s6, 4  ;;  %s77_s7 = int_to_ptr.vmem [resolvable:$true] %s76_s7 }
  0x28   :  { %v61_v4 = vsub.f32 %v57_v0, %v59_v2  ;;  %v62_v5 = vsub.f32 %v58_v1, %v60_v3  ;;  %s136_s8 = scalar_lea.vmem %s77_s7, 128  ;;  %p141_p3 = scmp.lt.s32.totalorder %s77_s7, %s77_s7 }
  0x29   :  { %p137_p2 = scmp.ne.s32.totalorder %s77_s7, %s136_s8  ;;  %p142_p4 = scmp.lt.s32.totalorder %s136_s8, %s136_s8 }
  0x2a   :  { %v63_v6 = vmul.f32 %v61_v4, %v61_v4  ;;  %v64_v7 = vmul.f32 %v62_v5, %v62_v5 }
  0x2b   :  { %p143_p5 = por %p142_p4, %p141_p3 }
  0x2c   :  { %v65_v8 = vadd.f32 %v64_v7, %v63_v6 }
  0x2d   :  { %p144_p6 = pnand %p143_p5, %p137_p2 }
  0x2e   :  { %69 = vst [vmem:[#allocation7] sm:$0xff] %v65_v8 }
  0x2f   :  { %147 = shalt.err (!%p144_p6)
}
  0x30   :  { %s148_s10 = scalar_lea.hbm %s222_s2, 128 }
  0x31   :  { %p149_p7 = scmp.ne.s32.totalorder %s222_s2, %s148_s10  ;;  %p152_p8 = scmp.lt.u32.totalorder %s148_s10, %s222_s2 }
  0x33   :  { %p154_p9 = pnand %p152_p8, %p149_p7 }
  0x35   :  { %157 = shalt.err (!%p154_p9)
}
  0x36   :  { %79 = dma.vmem_to_hbm [thread:$0]  %s77_s7, 128, %s222_s2, [#allocation4]  }
  0x37   :  { %162 = dma.done.wait [#allocation4], 128  }
  0x38   :  { %163 = vsyncadd [#allocation4], 4294967168 }
  0x39   :  { %83 = vsyncpa [#allocation3], 1 }
  0x3a   :  { %84 = vsyncpa [#allocation6], 1 }
  0x3b   :  { %85 = vsyncpa [#allocation4], 1 }

</bundles_post_ra>
